<compile_context>
chip_gen: v7x
topology: tpu7x:2x2x1
jax: 0.10.0
libtpu: 0.0.40
codegen_flags: <defaults>
</compile_context>

<pallas_src>
from functools import partial

import jax
import jax.numpy as jnp
from jax.experimental import pallas as pl
from jax.experimental.pallas import tpu as pltpu


def _mha_kernel(q_ref, kv_ref, wq_ref, wkv_ref, wo_ref,
                bq_ref, bkv_ref, bo_ref, o_ref,
                *, num_heads, head_dim, batch_block, lq, lkv, mm_dtype):
    dq = num_heads * head_dim
    scale = 1.0 / (head_dim ** 0.5)

    # Residual copy kept in f32 regardless of matmul operand dtype.
    q_res = q_ref[...].astype(jnp.float32)                      # (BB*Lq, Dq)

    qm = q_ref[...].astype(mm_dtype)
    kvm = kv_ref[...].astype(mm_dtype)

    # Input projections on the whole folded batch block (f32 accumulate).
    # 1/sqrt(head_dim) is folded into Q once (bias included, as in PyTorch).
    Q = (jnp.dot(qm, wq_ref[...], preferred_element_type=jnp.float32)
         + bq_ref[...]) * scale                                  # (BB*Lq, Dq)
    KV = (jnp.dot(kvm, wkv_ref[...], preferred_element_type=jnp.float32)
          + bkv_ref[...])                                        # (BB*Lkv, 2*Dq)
    K = KV[:, :dq]
    V = KV[:, dq:]

    # Attention core: tiny per-(batch, head) matmuls; contexts stay in vregs.
    ctx_rows = []
    for b in range(batch_block):
        qr = slice(b * lq, (b + 1) * lq)
        kr = slice(b * lkv, (b + 1) * lkv)
        ctx_heads = []
        for h in range(num_heads):
            hs = slice(h * head_dim, (h + 1) * head_dim)
            Qh = Q[qr, hs].astype(mm_dtype)                      # (Lq, Dh)
            Kh = K[kr, hs].astype(mm_dtype)                      # (Lkv, Dh)
            Vh = V[kr, hs].astype(mm_dtype)                      # (Lkv, Dh)

            # Q @ K^T via dot_general on the last axes (no transpose).
            s = jax.lax.dot_general(
                Qh, Kh, (((1,), (1,)), ((), ())),
                preferred_element_type=jnp.float32)              # (Lq, Lkv)

            m = jnp.max(s, axis=-1, keepdims=True)
            e = jnp.exp(s - m)                                   # f32
            denom = jnp.sum(e, axis=-1, keepdims=True)           # (Lq, 1)

            # Deferred normalization: (e @ V) * (1/denom).
            ctx_un = jnp.dot(e.astype(mm_dtype), Vh,
                             preferred_element_type=jnp.float32)  # (Lq, Dh)
            inv = pl.reciprocal(denom, approx=False)
            # attention-dropout: identity in eval mode
            ctx_heads.append(ctx_un * inv)
        ctx_rows.append(jnp.concatenate(ctx_heads, axis=-1))     # (Lq, Dq)

    ctx = ctx_rows[0] if batch_block == 1 else jnp.concatenate(ctx_rows, axis=0)

    # Output projection + residual.  Outer dropout: identity in eval mode.
    out = (jnp.dot(ctx.astype(mm_dtype), wo_ref[...],
                   preferred_element_type=jnp.float32) + bo_ref[...])
    o_ref[...] = (q_res + out).astype(o_ref.dtype)


def multi_head_attention(q, kv, params, *, num_heads, batch_block=None,
                         matmul_dtype=None):
    """q: (B, Lq, Dq), kv: (B, Lkv, Dkv) -> (B, Lq, Dq)."""
    B, Lq, Dq = q.shape
    _, Lkv, Dkv = kv.shape
    assert Dq % num_heads == 0
    head_dim = Dq // num_heads

    # Matmul-operand dtype (bf16 on v6e/v7x is the native MXU fast path);
    # accumulation and all elementwise/softmax math stay f32.
    mm = jnp.dtype(matmul_dtype) if matmul_dtype is not None else q.dtype

    # Batch-block size: fold batch into the row (sublane) dimension, but keep
    # >= 2 grid steps when possible so v7x's two TensorCores are both used.
    if batch_block is None:
        batch_block = B // 2 if (B >= 2 and B % 2 == 0) else B
    assert B % batch_block == 0
    num_blocks = B // batch_block

    wq, wk, wv, wo = params["wq"], params["wk"], params["wv"], params["wo"]
    bq, bk, bv, bo = params["bq"], params["bk"], params["bv"], params["bo"]

    # Glue: pre-transpose weights, fuse K/V projection weights/biases, make
    # biases 2-D, flatten batch into rows.  All cheap/free XLA-side ops.
    wq_t = wq.T.astype(mm)                                        # (Dq,  Dq)
    wkv_t = jnp.concatenate([wk.T, wv.T], axis=1).astype(mm)      # (Dkv, 2*Dq)
    wo_t = wo.T.astype(mm)                                        # (Dq,  Dq)
    bq2 = bq.reshape(1, Dq).astype(jnp.float32)
    bkv2 = jnp.concatenate([bk, bv]).reshape(1, 2 * Dq).astype(jnp.float32)
    bo2 = bo.reshape(1, Dq).astype(jnp.float32)
    q2 = q.reshape(B * Lq, Dq)
    kv2 = kv.reshape(B * Lkv, Dkv)

    rows_q = batch_block * Lq
    rows_kv = batch_block * Lkv

    kernel = partial(_mha_kernel, num_heads=num_heads, head_dim=head_dim,
                     batch_block=batch_block, lq=Lq, lkv=Lkv, mm_dtype=mm)

    out2 = pl.pallas_call(
        kernel,
        out_shape=jax.ShapeDtypeStruct((B * Lq, Dq), q.dtype),
        grid=(num_blocks,),
        in_specs=[
            pl.BlockSpec((rows_q, Dq), lambda i: (i, 0)),       # q   (batch block)
            pl.BlockSpec((rows_kv, Dkv), lambda i: (i, 0)),     # kv  (batch block)
            pl.BlockSpec((Dq, Dq), lambda i: (0, 0)),           # Wq^T
            pl.BlockSpec((Dkv, 2 * Dq), lambda i: (0, 0)),      # [Wk^T | Wv^T]
            pl.BlockSpec((Dq, Dq), lambda i: (0, 0)),           # Wo^T
            pl.BlockSpec((1, Dq), lambda i: (0, 0)),            # bq
            pl.BlockSpec((1, 2 * Dq), lambda i: (0, 0)),        # [bk | bv]
            pl.BlockSpec((1, Dq), lambda i: (0, 0)),            # bo
        ],
        out_specs=pl.BlockSpec((rows_q, Dq), lambda i: (i, 0)),
        compiler_params=pltpu.CompilerParams(
            dimension_semantics=("parallel",)),
    )(q2, kv2, wq_t, wkv_t, wo_t, bq2, bkv2, bo2)

    return out2.reshape(B, Lq, Dq)


def _reference(q, kv, params, *, num_heads):
    """Plain-JAX reference matching torch.nn.MultiheadAttention (eval mode)."""
    B, Lq, Dq = q.shape
    _, Lkv, Dkv = kv.shape
    Dh = Dq // num_heads
    Q = q @ params["wq"].T + params["bq"]
    K = kv @ params["wk"].T + params["bk"]
    V = kv @ params["wv"].T + params["bv"]
    Qh = Q.reshape(B, Lq, num_heads, Dh).transpose(0, 2, 1, 3)
    Kh = K.reshape(B, Lkv, num_heads, Dh).transpose(0, 2, 1, 3)
    Vh = V.reshape(B, Lkv, num_heads, Dh).transpose(0, 2, 1, 3)
    scores = jnp.einsum("bhqd,bhkd->bhqk", Qh, Kh) / jnp.sqrt(Dh).astype(jnp.float32)
    p = jax.nn.softmax(scores, axis=-1)
    ctx = jnp.einsum("bhqk,bhkd->bhqd", p, Vh)
    ctx = ctx.transpose(0, 2, 1, 3).reshape(B, Lq, Dq)
    out = ctx @ params["wo"].T + params["bo"]
    return q + out


if __name__ == "__main__":
    # Small shapes consistent with the module: (bs, lenq, d_q) / (bs, lenkv, d_kv)
    B, Lq, Lkv = 2, 8, 16
    num_heads = 4
    num_q_channels = 32      # embed_dim
    num_kv_channels = 16     # kdim == vdim

    key = jax.random.PRNGKey(0)
    k_q, k_kv, k_wq, k_wk, k_wv, k_wo, k_b = jax.random.split(key, 7)

    q = jax.random.normal(k_q, (B, Lq, num_q_channels), dtype=jnp.float32)
    kv = jax.random.normal(k_kv, (B, Lkv, num_kv_channels), dtype=jnp.float32)

    # Deterministic synthetic parameters (same shapes as nn.MultiheadAttention
    # with kdim != embed_dim: separate q/k/v projection weights + out_proj).
    params = {
        "wq": 0.05 * jax.random.normal(k_wq, (num_q_channels, num_q_channels), jnp.float32),
        "wk": 0.05 * jax.random.normal(k_wk, (num_q_channels, num_kv_channels), jnp.float32),
        "wv": 0.05 * jax.random.normal(k_wv, (num_q_channels, num_kv_channels), jnp.float32),
        "wo": 0.05 * jax.random.normal(k_wo, (num_q_channels, num_q_channels), jnp.float32),
        "bq": 0.01 * jax.random.normal(jax.random.fold_in(k_b, 0), (num_q_channels,), jnp.float32),
        "bk": 0.01 * jax.random.normal(jax.random.fold_in(k_b, 1), (num_q_channels,), jnp.float32),
        "bv": 0.01 * jax.random.normal(jax.random.fold_in(k_b, 2), (num_q_channels,), jnp.float32),
        "bo": 0.01 * jax.random.normal(jax.random.fold_in(k_b, 3), (num_q_channels,), jnp.float32),
    }

    ref = _reference(q, kv, params, num_heads=num_heads)

    # f32 path (exact, matches reference tightly).
    out = multi_head_attention(q, kv, params, num_heads=num_heads)
    out = jax.block_until_ready(out)
    assert out.shape == (B, Lq, num_q_channels)
    assert jnp.allclose(out, ref, atol=1e-4, rtol=1e-4), "mismatch vs reference (f32)"

    # bf16-operand / f32-accumulate fast path (native MXU on v6e/v7x).
    out_bf16 = multi_head_attention(q, kv, params, num_heads=num_heads,
                                    matmul_dtype=jnp.bfloat16)
    out_bf16 = jax.block_until_ready(out_bf16)
    assert jnp.allclose(out_bf16, ref, atol=3e-2, rtol=3e-2), "mismatch vs reference (bf16)"

    # TODO(synk): dropout (attention-weight and output) is eval-mode identity here;
    # training-mode stochastic dropout (pltpu.prng_*) is not implemented.
    print("KERNEL_OK")
</pallas_src>

<mosaic_0001>
module attributes {stable_mosaic.version = 11 : i64} {
  func.func @_mha_kernel(%arg0: i32, %arg1: memref<8x32xf32, #tpu.memory_space<vmem>>, %arg2: memref<16x16xf32, #tpu.memory_space<vmem>>, %arg3: memref<32x32xf32, #tpu.memory_space<vmem>>, %arg4: memref<16x64xf32, #tpu.memory_space<vmem>>, %arg5: memref<32x32xf32, #tpu.memory_space<vmem>>, %arg6: memref<1x32xf32, #tpu.memory_space<vmem>>, %arg7: memref<1x64xf32, #tpu.memory_space<vmem>>, %arg8: memref<1x32xf32, #tpu.memory_space<vmem>>, %arg9: memref<8x32xf32, #tpu.memory_space<vmem>>) attributes {dimension_semantics = [#tpu.dimension_semantics<parallel>], iteration_bounds = array<i64: 2>, scalar_prefetch = 0 : i64, scratch_operands = 0 : i64, tpu.core_type = #tpu.core_type<tc>, window_params = [{transform_indices = @transform_0, window_bounds = array<i64: 8, 32>}, {transform_indices = @transform_1, window_bounds = array<i64: 16, 16>}, {pipeline_mode = #tpu.pipeline_mode<synchronous>, transform_indices = @transform_2, window_bounds = array<i64: 32, 32>}, {pipeline_mode = #tpu.pipeline_mode<synchronous>, transform_indices = @transform_3, window_bounds = array<i64: 16, 64>}, {pipeline_mode = #tpu.pipeline_mode<synchronous>, transform_indices = @transform_4, window_bounds = array<i64: 32, 32>}, {pipeline_mode = #tpu.pipeline_mode<synchronous>, transform_indices = @transform_5, window_bounds = array<i64: 1, 32>}, {pipeline_mode = #tpu.pipeline_mode<synchronous>, transform_indices = @transform_6, window_bounds = array<i64: 1, 64>}, {pipeline_mode = #tpu.pipeline_mode<synchronous>, transform_indices = @transform_7, window_bounds = array<i64: 1, 32>}, {transform_indices = @transform_8, window_bounds = array<i64: 8, 32>}]} {
    %c0 = arith.constant 0 : index
    %c0_0 = arith.constant 0 : index
    %0 = vector.load %arg1[%c0, %c0_0] : memref<8x32xf32, #tpu.memory_space<vmem>>, vector<8x32xf32>
    %c0_1 = arith.constant 0 : index
    %c0_2 = arith.constant 0 : index
    %1 = vector.load %arg1[%c0_1, %c0_2] : memref<8x32xf32, #tpu.memory_space<vmem>>, vector<8x32xf32>
    %c0_3 = arith.constant 0 : index
    %c0_4 = arith.constant 0 : index
    %2 = vector.load %arg2[%c0_3, %c0_4] : memref<16x16xf32, #tpu.memory_space<vmem>>, vector<16x16xf32>
    %c0_5 = arith.constant 0 : index
    %c0_6 = arith.constant 0 : index
    %3 = vector.load %arg3[%c0_5, %c0_6] : memref<32x32xf32, #tpu.memory_space<vmem>>, vector<32x32xf32>
    %cst = arith.constant dense<0.000000e+00> : vector<8x32xf32>
    %4 = tpu.matmul %1, %3, %cst {dimension_numbers = #tpu.dot_dimension_numbers<[1], [0], [0], [1], [0, 0, 1, 1], [], []>} : vector<8x32xf32>, vector<32x32xf32>, vector<8x32xf32> -> vector<8x32xf32>
    %c0_7 = arith.constant 0 : index
    %c0_8 = arith.constant 0 : index
    %5 = vector.load %arg6[%c0_7, %c0_8] : memref<1x32xf32, #tpu.memory_space<vmem>>, vector<1x32xf32>
    %6 = vector.broadcast %5 : vector<1x32xf32> to vector<8x32xf32>
    %7 = arith.addf %4, %6 : vector<8x32xf32>
    %cst_9 = arith.constant 0.353553385 : f32
    %8 = vector.broadcast %cst_9 : f32 to vector<8x32xf32>
    %9 = arith.mulf %7, %8 : vector<8x32xf32>
    %c0_10 = arith.constant 0 : index
    %c0_11 = arith.constant 0 : index
    %10 = vector.load %arg4[%c0_10, %c0_11] : memref<16x64xf32, #tpu.memory_space<vmem>>, vector<16x64xf32>
    %cst_12 = arith.constant dense<0.000000e+00> : vector<16x64xf32>
    %11 = tpu.matmul %2, %10, %cst_12 {dimension_numbers = #tpu.dot_dimension_numbers<[1], [0], [0], [1], [0, 0, 1, 1], [], []>} : vector<16x16xf32>, vector<16x64xf32>, vector<16x64xf32> -> vector<16x64xf32>
    %c0_13 = arith.constant 0 : index
    %c0_14 = arith.constant 0 : index
    %12 = vector.load %arg7[%c0_13, %c0_14] : memref<1x64xf32, #tpu.memory_space<vmem>>, vector<1x64xf32>
    %13 = vector.broadcast %12 : vector<1x64xf32> to vector<16x64xf32>
    %14 = arith.addf %11, %13 : vector<16x64xf32>
    %15 = vector.extract_strided_slice %14 {offsets = [0, 0], sizes = [16, 32], strides = [1, 1]} : vector<16x64xf32> to vector<16x32xf32>
    %16 = vector.extract_strided_slice %14 {offsets = [0, 32], sizes = [16, 32], strides = [1, 1]} : vector<16x64xf32> to vector<16x32xf32>
    %17 = vector.extract_strided_slice %9 {offsets = [0, 0], sizes = [8, 8], strides = [1, 1]} : vector<8x32xf32> to vector<8x8xf32>
    %18 = vector.extract_strided_slice %15 {offsets = [0, 0], sizes = [16, 8], strides = [1, 1]} : vector<16x32xf32> to vector<16x8xf32>
    %19 = vector.extract_strided_slice %16 {offsets = [0, 0], sizes = [16, 8], strides = [1, 1]} : vector<16x32xf32> to vector<16x8xf32>
    %cst_15 = arith.constant dense<0.000000e+00> : vector<8x16xf32>
    %20 = tpu.matmul %17, %18, %cst_15 {dimension_numbers = #tpu.dot_dimension_numbers<[1], [1], [0], [0], [0, 0, 1, 0], [], []>} : vector<8x8xf32>, vector<16x8xf32>, vector<8x16xf32> -> vector<8x16xf32>
    %cst_16 = arith.constant dense<0xFF800000> : vector<8xf32>
    %21 = vector.multi_reduction <maximumf>, %20, %cst_16 [1] : vector<8x16xf32> to vector<8xf32>
    %22 = vector.shape_cast %21 : vector<8xf32> to vector<8x1xf32>
    %23 = vector.broadcast %22 : vector<8x1xf32> to vector<8x16xf32>
    %24 = arith.subf %20, %23 : vector<8x16xf32>
    %25 = math.exp %24 : vector<8x16xf32>
    %cst_17 = arith.constant dense<0.000000e+00> : vector<8xf32>
    %26 = vector.multi_reduction <add>, %25, %cst_17 [1] : vector<8x16xf32> to vector<8xf32>
    %27 = vector.shape_cast %26 : vector<8xf32> to vector<8x1xf32>
    %cst_18 = arith.constant dense<0.000000e+00> : vector<8x8xf32>
    %28 = tpu.matmul %25, %19, %cst_18 {dimension_numbers = #tpu.dot_dimension_numbers<[1], [0], [0], [1], [0, 0, 1, 1], [], []>} : vector<8x16xf32>, vector<16x8xf32>, vector<8x8xf32> -> vector<8x8xf32>
    %29 = tpu.reciprocal %27 : vector<8x1xf32> -> vector<8x1xf32>
    %30 = vector.broadcast %29 : vector<8x1xf32> to vector<8x8xf32>
    %31 = arith.mulf %28, %30 : vector<8x8xf32>
    %32 = vector.extract_strided_slice %9 {offsets = [0, 8], sizes = [8, 8], strides = [1, 1]} : vector<8x32xf32> to vector<8x8xf32>
    %33 = vector.extract_strided_slice %15 {offsets = [0, 8], sizes = [16, 8], strides = [1, 1]} : vector<16x32xf32> to vector<16x8xf32>
    %34 = vector.extract_strided_slice %16 {offsets = [0, 8], sizes = [16, 8], strides = [1, 1]} : vector<16x32xf32> to vector<16x8xf32>
    %cst_19 = arith.constant dense<0.000000e+00> : vector<8x16xf32>
    %35 = tpu.matmul %32, %33, %cst_19 {dimension_numbers = #tpu.dot_dimension_numbers<[1], [1], [0], [0], [0, 0, 1, 0], [], []>} : vector<8x8xf32>, vector<16x8xf32>, vector<8x16xf32> -> vector<8x16xf32>
    %cst_20 = arith.constant dense<0xFF800000> : vector<8xf32>
    %36 = vector.multi_reduction <maximumf>, %35, %cst_20 [1] : vector<8x16xf32> to vector<8xf32>
    %37 = vector.shape_cast %36 : vector<8xf32> to vector<8x1xf32>
    %38 = vector.broadcast %37 : vector<8x1xf32> to vector<8x16xf32>
    %39 = arith.subf %35, %38 : vector<8x16xf32>
    %40 = math.exp %39 : vector<8x16xf32>
    %cst_21 = arith.constant dense<0.000000e+00> : vector<8xf32>
    %41 = vector.multi_reduction <add>, %40, %cst_21 [1] : vector<8x16xf32> to vector<8xf32>
    %42 = vector.shape_cast %41 : vector<8xf32> to vector<8x1xf32>
    %cst_22 = arith.constant dense<0.000000e+00> : vector<8x8xf32>
    %43 = tpu.matmul %40, %34, %cst_22 {dimension_numbers = #tpu.dot_dimension_numbers<[1], [0], [0], [1], [0, 0, 1, 1], [], []>} : vector<8x16xf32>, vector<16x8xf32>, vector<8x8xf32> -> vector<8x8xf32>
    %44 = tpu.reciprocal %42 : vector<8x1xf32> -> vector<8x1xf32>
    %45 = vector.broadcast %44 : vector<8x1xf32> to vector<8x8xf32>
    %46 = arith.mulf %43, %45 : vector<8x8xf32>
    %47 = vector.extract_strided_slice %9 {offsets = [0, 16], sizes = [8, 8], strides = [1, 1]} : vector<8x32xf32> to vector<8x8xf32>
    %48 = vector.extract_strided_slice %15 {offsets = [0, 16], sizes = [16, 8], strides = [1, 1]} : vector<16x32xf32> to vector<16x8xf32>
    %49 = vector.extract_strided_slice %16 {offsets = [0, 16], sizes = [16, 8], strides = [1, 1]} : vector<16x32xf32> to vector<16x8xf32>
    %cst_23 = arith.constant dense<0.000000e+00> : vector<8x16xf32>
    %50 = tpu.matmul %47, %48, %cst_23 {dimension_numbers = #tpu.dot_dimension_numbers<[1], [1], [0], [0], [0, 0, 1, 0], [], []>} : vector<8x8xf32>, vector<16x8xf32>, vector<8x16xf32> -> vector<8x16xf32>
    %cst_24 = arith.constant dense<0xFF800000> : vector<8xf32>
    %51 = vector.multi_reduction <maximumf>, %50, %cst_24 [1] : vector<8x16xf32> to vector<8xf32>
    %52 = vector.shape_cast %51 : vector<8xf32> to vector<8x1xf32>
    %53 = vector.broadcast %52 : vector<8x1xf32> to vector<8x16xf32>
    %54 = arith.subf %50, %53 : vector<8x16xf32>
    %55 = math.exp %54 : vector<8x16xf32>
    %cst_25 = arith.constant dense<0.000000e+00> : vector<8xf32>
    %56 = vector.multi_reduction <add>, %55, %cst_25 [1] : vector<8x16xf32> to vector<8xf32>
    %57 = vector.shape_cast %56 : vector<8xf32> to vector<8x1xf32>
    %cst_26 = arith.constant dense<0.000000e+00> : vector<8x8xf32>
    %58 = tpu.matmul %55, %49, %cst_26 {dimension_numbers = #tpu.dot_dimension_numbers<[1], [0], [0], [1], [0, 0, 1, 1], [], []>} : vector<8x16xf32>, vector<16x8xf32>, vector<8x8xf32> -> vector<8x8xf32>
    %59 = tpu.reciprocal %57 : vector<8x1xf32> -> vector<8x1xf32>
    %60 = vector.broadcast %59 : vector<8x1xf32> to vector<8x8xf32>
    %61 = arith.mulf %58, %60 : vector<8x8xf32>
    %62 = vector.extract_strided_slice %9 {offsets = [0, 24], sizes = [8, 8], strides = [1, 1]} : vector<8x32xf32> to vector<8x8xf32>
    %63 = vector.extract_strided_slice %15 {offsets = [0, 24], sizes = [16, 8], strides = [1, 1]} : vector<16x32xf32> to vector<16x8xf32>
    %64 = vector.extract_strided_slice %16 {offsets = [0, 24], sizes = [16, 8], strides = [1, 1]} : vector<16x32xf32> to vector<16x8xf32>
    %cst_27 = arith.constant dense<0.000000e+00> : vector<8x16xf32>
    %65 = tpu.matmul %62, %63, %cst_27 {dimension_numbers = #tpu.dot_dimension_numbers<[1], [1], [0], [0], [0, 0, 1, 0], [], []>} : vector<8x8xf32>, vector<16x8xf32>, vector<8x16xf32> -> vector<8x16xf32>
    %cst_28 = arith.constant dense<0xFF800000> : vector<8xf32>
    %66 = vector.multi_reduction <maximumf>, %65, %cst_28 [1] : vector<8x16xf32> to vector<8xf32>
    %67 = vector.shape_cast %66 : vector<8xf32> to vector<8x1xf32>
    %68 = vector.broadcast %67 : vector<8x1xf32> to vector<8x16xf32>
    %69 = arith.subf %65, %68 : vector<8x16xf32>
    %70 = math.exp %69 : vector<8x16xf32>
    %cst_29 = arith.constant dense<0.000000e+00> : vector<8xf32>
    %71 = vector.multi_reduction <add>, %70, %cst_29 [1] : vector<8x16xf32> to vector<8xf32>
    %72 = vector.shape_cast %71 : vector<8xf32> to vector<8x1xf32>
    %cst_30 = arith.constant dense<0.000000e+00> : vector<8x8xf32>
    %73 = tpu.matmul %70, %64, %cst_30 {dimension_numbers = #tpu.dot_dimension_numbers<[1], [0], [0], [1], [0, 0, 1, 1], [], []>} : vector<8x16xf32>, vector<16x8xf32>, vector<8x8xf32> -> vector<8x8xf32>
    %74 = tpu.reciprocal %72 : vector<8x1xf32> -> vector<8x1xf32>
    %75 = vector.broadcast %74 : vector<8x1xf32> to vector<8x8xf32>
    %76 = arith.mulf %73, %75 : vector<8x8xf32>
    %77 = tpu.concatenate %31, %46, %61, %76 in 1 : vector<8x8xf32>, vector<8x8xf32>, vector<8x8xf32>, vector<8x8xf32> -> vector<8x32xf32>
    %c0_31 = arith.constant 0 : index
    %c0_32 = arith.constant 0 : index
    %78 = vector.load %arg5[%c0_31, %c0_32] : memref<32x32xf32, #tpu.memory_space<vmem>>, vector<32x32xf32>
    %cst_33 = arith.constant dense<0.000000e+00> : vector<8x32xf32>
    %79 = tpu.matmul %77, %78, %cst_33 {dimension_numbers = #tpu.dot_dimension_numbers<[1], [0], [0], [1], [0, 0, 1, 1], [], []>} : vector<8x32xf32>, vector<32x32xf32>, vector<8x32xf32> -> vector<8x32xf32>
    %c0_34 = arith.constant 0 : index
    %c0_35 = arith.constant 0 : index
    %80 = vector.load %arg8[%c0_34, %c0_35] : memref<1x32xf32, #tpu.memory_space<vmem>>, vector<1x32xf32>
    %81 = vector.broadcast %80 : vector<1x32xf32> to vector<8x32xf32>
    %82 = arith.addf %79, %81 : vector<8x32xf32>
    %83 = arith.addf %0, %82 : vector<8x32xf32>
    %c0_36 = arith.constant 0 : index
    %c0_37 = arith.constant 0 : index
    %84 = vector.load %arg9[%c0_36, %c0_37] : memref<8x32xf32, #tpu.memory_space<vmem>>, vector<8x32xf32>
    tpu.vector_store %arg9[%c0_36, %c0_37], %83 {strides = array<i32>} : memref<8x32xf32, #tpu.memory_space<vmem>>, vector<8x32xf32>,
    return
  }
  func.func @transform_0(%arg0: i32) -> (i32, i32) {
    %c0_i32 = arith.constant 0 : i32
    %c0_i32_0 = arith.constant 0 : i32
    return %arg0, %c0_i32 : i32, i32
  }
  func.func @transform_1(%arg0: i32) -> (i32, i32) {
    %c0_i32 = arith.constant 0 : i32
    %c0_i32_0 = arith.constant 0 : i32
    return %arg0, %c0_i32 : i32, i32
  }
  func.func @transform_2(%arg0: i32) -> (i32, i32) {
    %c0_i32 = arith.constant 0 : i32
    %c0_i32_0 = arith.constant 0 : i32
    %c0_i32_1 = arith.constant 0 : i32
    return %c0_i32, %c0_i32_0 : i32, i32
  }
  func.func @transform_3(%arg0: i32) -> (i32, i32) {
    %c0_i32 = arith.constant 0 : i32
    %c0_i32_0 = arith.constant 0 : i32
    %c0_i32_1 = arith.constant 0 : i32
    return %c0_i32, %c0_i32_0 : i32, i32
  }
  func.func @transform_4(%arg0: i32) -> (i32, i32) {
    %c0_i32 = arith.constant 0 : i32
    %c0_i32_0 = arith.constant 0 : i32
    %c0_i32_1 = arith.constant 0 : i32
    return %c0_i32, %c0_i32_0 : i32, i32
  }
  func.func @transform_5(%arg0: i32) -> (i32, i32) {
    %c0_i32 = arith.constant 0 : i32
    %c0_i32_0 = arith.constant 0 : i32
    %c0_i32_1 = arith.constant 0 : i32
    return %c0_i32, %c0_i32_0 : i32, i32
  }
  func.func @transform_6(%arg0: i32) -> (i32, i32) {
    %c0_i32 = arith.constant 0 : i32
    %c0_i32_0 = arith.constant 0 : i32
    %c0_i32_1 = arith.constant 0 : i32
    return %c0_i32, %c0_i32_0 : i32, i32
  }
  func.func @transform_7(%arg0: i32) -> (i32, i32) {
    %c0_i32 = arith.constant 0 : i32
    %c0_i32_0 = arith.constant 0 : i32
    %c0_i32_1 = arith.constant 0 : i32
    return %c0_i32, %c0_i32_0 : i32, i32
  }
  func.func @transform_8(%arg0: i32) -> (i32, i32) {
    %c0_i32 = arith.constant 0 : i32
    %c0_i32_0 = arith.constant 0 : i32
    return %arg0, %c0_i32 : i32, i32
  }
}

</mosaic_0001>

<bundles_post_ra>
// kernel: tpu_custom_call.1
= control target key start
LH: loop header
LB: loop body
LE: loop exit
PB: predicated region body
PF: predicated region fallthrough
CT: control target
= control target key end

     0   :  { %13 = vsyncpa [#allocation3], 0  ;;  %s2237_s0 = inlined_call_operand.vmem [shape: f32[16,32], index: 0, kind: input, shape index: {}]   ;;  %s2238_s1 = inlined_call_operand.vmem [shape: f32[32,16], index: 1, kind: input, shape index: {}]   ;;  %s2239_s2 = inlined_call_operand.vmem [shape: f32[32,32], index: 2, kind: input, shape index: {}]   ;;  %s2240_s3 = inlined_call_operand.hbm [shape: f32[16,64], index: 3, kind: input, shape index: {}]   ;;  %s2241_s4 = inlined_call_operand.hbm [shape: f32[32,32], index: 4, kind: input, shape index: {}]   ;;  %s2242_s5 = inlined_call_operand.vmem [shape: f32[1,32], index: 5, kind: input, shape index: {}]   ;;  %s2243_s6 = inlined_call_operand.vmem [shape: f32[1,64], index: 6, kind: input, shape index: {}]   ;;  %s2244_s7 = inlined_call_operand.vmem [shape: f32[1,32], index: 7, kind: input, shape index: {}]   ;;  %s2245_s8 = inlined_call_operand.hbm [shape: f32[16,32], index: 8, kind: output, shape index: {}]  }
   0x1   :  { %14 = vsyncpa [#allocation6], 0 }
   0x2   :  { %15 = vsyncpa [#allocation4], 0 }
   0x3   :  { %17 = vsyncpa [#allocation4 + $0x1], 0  ;;  %s1951_s27 = smov 0   ;;  %s1953_s28 = smov 0  }
   0x4   :  { %s1955_s29 = smov 0   ;;  %s1957_s30 = smov 0  }
   0x5 LB: > { %2250 = sst [smem:[#allocation11_spill]] %s1882_s29  ;;  %s1972_s9 = sadd.s32 4294967295, %s1886_s30   ;;  %s1886_s30 = sphi %s1957_s30, %s2269_s30   ;;  %s1882_s29 = sphi %s1955_s29, %s2266_s29   ;;  %s1878_s28 = sphi %s1953_s28, %s2268_s28   ;;  %s1874_s27 = sphi %s1951_s27, %s2267_s27  }
   0x6   : > { %s1428_s10 = sadd.s32 4294967294, %s1886_s30   ;;  %s1976_s11 = sadd.s32 1, %s1886_s30  }
   0x7   : > { %s208_s12 = sadd.s32 1, %s1882_s29  ;;  %s205_s13 = ssub.s32 %s1886_s30, %s1976_s11 }
   0x8   : > { %p218_p0 = scmp.ne.s32.totalorder %s1882_s29, %s1878_s28  ;;  %p206_p1 = scmp.eq.s32.totalorder %s205_s13, 0 }
   0x9   : > { %p219_p2 = scmp.eq.s32.totalorder %s1972_s9, 1  ;;  %p224_p3 = scmp.ne.s32.totalorder %s1878_s28, %s1874_s27 }
   0xa   : > { %p225_p4 = scmp.eq.s32.totalorder %s1428_s10, 1  ;;  %p1429_p7 = scmp.ge.s32.totalorder %s1886_s30, 1 }
   0xb   : > { %s1987_s14 = scalar_select %p206_p1, %s1882_s29, %s208_s12  }
   0xc   : > { %p1989_p5 = por %p219_p2, %p218_p0  ;;  %p1993_p6 = por %p225_p4, %p224_p3 }
   0xd   : > { %2251 = sst [smem:[#allocation12_spill]] %s1987_s14  ;;  %p232_p8 = scmp.lt.s32.totalorder %s1886_s30, 3 }
   0xe   : > { %s2252_s15 = scalar_select %p1989_p5, 1, 0 }
   0xf   : > { %s2253_s16 = scalar_select %p1993_p6, 1, 0 }
  0x10   : > { %p2246_p9 = scmp.eq.s32.totalorder %s1972_s9, 0  ;;  %p2000_p10 = pnand %p1429_p7, %p232_p8 }
  0x11   : > { %s1888_s18 = smov [#allocation2]   ;;  %s1889_s21 = smov [#allocation5]  }
  0x12   : > { %s2254_s17 = scalar_select %p2000_p10, 1, 0 }
  0x13   : > { %s247_s19 = sshll.u32 %s1888_s18, 4  ;;  %p1644_p11 = pneg %p2000_p10  ;;  %s248_s19 = int_to_ptr.vmem [resolvable:$true] %s247_s19 }
  0x14   : > { %s260_s22 = sshll.u32 %s1889_s21, 4  ;;  %s1760_s25 = scalar_lea.hbm %s2240_s3, 256  ;;  %s2012_s22 = int_to_ptr.vmem [resolvable:$true] %s260_s22 }
  0x15   : > { %p2008_p12 = pnand %p2246_p9, %p1644_p11  ;;  %p1761_p13 = scmp.ne.s32.totalorder %s2240_s3, %s1760_s25 }
  0x16   : > { %p1767_p3 = scmp.lt.u32.totalorder %s1760_s25, %s2240_s3 }
  0x17   : > { %p1762_p0 = pneg %p2008_p12 }
  0x19   : > { %p1763_p1 = pnand %p1762_p0, %p1761_p13 }
  0x1b   : > { %p1764_p2 = pneg %p1763_p1 }
  0x1d   : > { %p1769_p4 = pnand %p1767_p3, %p1764_p2 }
  0x1f   : > { %1772 = shalt.err (!%p1769_p4)
}
  0x20   : > { %s1773_s18 = scalar_lea.vmem %s248_s19, 256  ;;  %p1781_p9 = scmp.lt.s32.totalorder %s248_s19, %s248_s19 }
  0x21   : > { %p1774_p7 = scmp.ne.s32.totalorder %s248_s19, %s1773_s18  ;;  %p1782_p6 = scmp.lt.s32.totalorder %s1773_s18, %s1773_s18 }
  0x23   : > { %p1776_p8 = pnand %p1774_p7, %p1762_p0  ;;  %p1783_p5 = por %p1782_p6, %p1781_p9 }
  0x25   : > { %p1777_p11 = pneg %p1776_p8 }
  0x27   : > { %p1784_p10 = pnand %p1783_p5, %p1777_p11 }
  0x29   : > { %1787 = shalt.err (!%p1784_p10)
}
  0x2a   : > { %s1890_s21 = smov 128   ;;  %s1891_s23 = smov 8  }
  0x2b   : > { %1647 = dma.hbm_to_vmem [thread:$0]  (!%p2008_p12), %s2240_s3, 256, %s248_s19, [#allocation3], %s1890_s21, %s1890_s21, %s1891_s23  }
  0x2c   : > { %s1788_s12 = scalar_lea.hbm %s2241_s4, 512 }
  0x2d   : > { %p1789_p13 = scmp.ne.s32.totalorder %s2241_s4, %s1788_s12  ;;  %p1795_p9 = scmp.lt.u32.totalorder %s1788_s12, %s2241_s4 }
  0x2f   : > { %p1791_p5 = pnand %p1789_p13, %p1762_p0 }
  0x31   : > { %p1792_p6 = pneg %p1791_p5 }
  0x33   : > { %p1797_p10 = pnand %p1795_p9, %p1792_p6 }
  0x35   : > { %1800 = shalt.err (!%p1797_p10)
}
  0x36   : > { %s1801_s19 = scalar_lea.vmem %s2012_s22, 512  ;;  %p1809_p4 = scmp.lt.s32.totalorder %s2012_s22, %s2012_s22 }
  0x37   : > { %p1802_p1 = scmp.ne.s32.totalorder %s2012_s22, %s1801_s19  ;;  %p1810_p7 = scmp.lt.s32.totalorder %s1801_s19, %s1801_s19 }
  0x39   : > { %p1804_p2 = pnand %p1802_p1, %p1762_p0  ;;  %p1811_p8 = por %p1810_p7, %p1809_p4 }
  0x3b   : > { %p1805_p3 = pneg %p1804_p2 }
  0x3d   : > { %p1812_p11 = pnand %p1811_p8, %p1805_p3 }
  0x3f   : > { %1815 = shalt.err (!%p1812_p11)
}
  0x40   : > { %1650 = dma.hbm_to_vmem [thread:$0]  (!%p2008_p12), %s2241_s4, 512, %s2012_s22, [#allocation6], %s1890_s21, %s1890_s21, %s1891_s23  }
  0x41   : > { %p2256_p13 = scmp.ne.s32.totalorder %s2254_s17, 0 }
  0x42   : > { %p2257_p5 = scmp.eq.s32.totalorder (!%p2256_p13), %s1972_s9, 0 }
  0x43   : > { %301 = sbr.rel (%p2256_p13) target bundleno = 2376 (0x948), region = 52 }
  0x4a   : > { %1861 = dma.done.wait (%p2257_p5), [#allocation3], 256   ;;  %p2258_p0 = pmov %p2257_p5 }
  0x4c   : > { %1863 = vsyncadd (%p2258_p0), [#allocation3], 4294967040  ;;  %p2259_p6 = pmov %p2258_p0 }
  0x4d   : > { %p2260_p9 = pmov %p2258_p0 }
  0x4e   : > { %1865 = dma.done.wait (%p2259_p6), [#allocation6], 512  }
  0x4f   : > { %1867 = vsyncadd (%p2260_p9), [#allocation6], 4294966784  ;;  %s1438_s20 = sshll.u32 %s1972_s9, 1  ;;  %v1892_v0 = vmov 0.0|0.0   ;;  %p343_p10 = scmp.lt.s32.totalorder %s1972_s9, 1  ;;  %vm1893_vm0 = vmmov 0  }
  0x50   : > { %1590 = vmatprep.subr.bf16.mxu0 %v1892_v0  ;;  %p348_p12 = scmp.lt.s32.totalorder %s1438_s20, 3  ;;  %v1894_v1 = vmov 0.0   ;;  %vm451_vm1 = vcmask 130048   ;;  %v442_v2 = vld [vmem:[#allocation2] sm:$0xff]  ;;  %v443_v3 = vld [vmem:[#allocation2 + $0x8] sm:$0xff]  ;;  %v358_v9 = vld [vmem:[%s2239_s2 + $0x10] sm:$0xff] }
  0x51   : > { %1513 = vmatprep.mubr.msk.f32.mxu0 %vm1893_vm0, %v1894_v1  ;;  %s344_s17 = scalar_select %p343_p10, %s1972_s9, 1  ;;  %v1596_v5 = vpack.c.bf16 %v443_v3, %v442_v2  ;;  %v356_v6 = vld [vmem:[%s2239_s2] sm:$0xff]  ;;  %v357_v7 = vld [vmem:[%s2239_s2 + $0x8] sm:$0xff]  ;;  %v359_v10 = vld [vmem:[%s2239_s2 + $0x18] sm:$0xff]  ;;  %vm367_vm2 = vcmask 261120   ;;  %vm533_vm3 = vcmask 64512  }
  0x52   : > { %s2271_s20 = smov (!%p348_p12, %s1438_s20), 3  ;;  %v1591_v8 = vpack.c.bf16 %v357_v7, %v356_v6  ;;  %v1594_v12 = vpack.c.bf16 %v359_v10, %v358_v9  ;;  %v1442_v14 = vld [vmem:[%s2243_s6] ss:$0 sm:$0xff]  ;;  %vm2116_vm4 = vmpackc.low %vm533_vm3, %vm533_vm3  ;;  %s1895_s26 = smov 120   ;;  %vm1233_vm5 = vcmask 195584  }
  0x53   : > { %s1439_s22 = sshll.u32 %s2271_s20, 3  ;;  %s1437_s14 = sshll.u32 %s344_s17, 3  ;;  %1597 = vmatprep.subr.bf16.mxu1 %v1596_v5  ;;  %v1440_v19 = vld [vmem:[%s2242_s5] ss:$0 sm:$0xff] }
  0x54   : > { %s351_s24 = scalar_lea.vmem %s2238_s1, %s1439_s22  ;;  %1599 = vmatpush3.bf16.msra.mxu1 %v1596_v5  ;;  %1592 = vmatpush3.bf16.msra.mxu0 %v1591_v8  ;;  %s346_s21 = scalar_lea.vmem %s2237_s0, %s1437_s14 }
  0x55   : > { %v354_v4 = vld [vmem:[%s351_s24] sm:$0xff]  ;;  %v355_v11 = vld [vmem:[%s351_s24 + $0x8] sm:$0xff]  ;;  %1593 = vmatprep.subr.bf16.mxu0 %v1892_v0  ;;  %1600 = vmatprep.subr.bf16.mxu1 %v1892_v0  ;;  %s1896_s10 = smov 96   ;;  %s1897_s12 = smov 88  }
  0x56   : > { %1520 = vmatprep.mubr.msk.f32.mxu1 %vm451_vm1, %v354_v4  ;;  %v2099_v13 = vld [vmem:[%s346_s21] sm:$0xff]  ;;  %s1898_s13 = smov 112   ;;  %s1899_s18 = smov 80  }
  0x57   : > { %1521 = vmatmul.mubr.msk.f32.vlgmr.msra.gmra.mrb[0].mxu1 %vm451_vm1, %v355_v11  ;;  %s1900_s19 = smov 104   ;;  %s1901_s29 = smov 72  }
  0x58   : > { %1595 = vmatpush3.bf16.msra.mxu0 %v1594_v12  ;;  %1527 = vmatprep.mubr.msk.f32.mxu1 %vm1893_vm0, %v1894_v1  ;;  %s1902_s14 = smov 8   ;;  %s1903_s20 = smov 16  }
  0x59   : > { %1604 = vmatprep.subr.bf16.mxu0 %v1892_v0  ;;  %s1904_s22 = smov 24   ;;  %s340_s21 = sand.u32 1, %s1878_s28  }
  0x5a   : > { %s1436_s17 = sshll.u32 %s340_s21, 3  ;;  %s1464_s25 = sshll.u32 %s1972_s9, 7 }
  0x5b   : > { %1514 = vmatmul.mubr.msk.f32.vlgmr.msra.gmra.mrb[0].mxu0 %vm367_vm2, %v2099_v13  ;;  %p2263_p2 = scmp.ne.s32.totalorder %s2252_s15, 0 }
  0x5c   : > { %1534 = vmatprep.mubr.msk.f32.mxu0 %vm1893_vm0, %v1894_v1 }
 0x12a   : > { %v1522_v15 = vpop.f32.mrb[0].mxu1 }
 0x12b   : > { %v530_v16 = vadd.f32 %v1522_v15, %v1442_v14  ;;  %v524_v17 = vpop.f32.mrb[1].mxu1 }
 0x12c   : > { %v525_v18 = vadd.f32 %v1442_v14, %v524_v17 }
 0x12e   : > { %v2120_v21 = vpack.i.bf16 %v530_v16, %v525_v18  ;;  %v1601_v22 = vpack.c.bf16 %v530_v16, %v525_v18  ;;  %v437_v23 = vpop.f32.mrb[0].mxu0 }
 0x12f   : > { %v438_v24 = vadd.f32 %v1440_v19, %v437_v23  ;;  %v1515_v25 = vpop.f32.mrb[1].mxu0 }
 0x130   : > { %1715 = vrot.lane.b32.xlu1 %v2120_v21, %s1895_s26  ;;  %1603 = vmatpush3.bf16.xpose.msk.msra.mxu1 %vm2116_vm4, %v1601_v22 }
 0x131   : > { %v441_v26 = vmul.f32 0.35355338, %v438_v24  ;;  %1611 = vmatprep.subr.bf16.mxu1 %v1892_v0 }
 0x134   : > { %703 = vrot.lane.b32.xlu1 %v441_v26, %s1895_s26  ;;  %s342_s26 = scalar_lea.vmem [#allocation7], %s1436_s17 }
 0x137   : > { %1528 = vmatmul.mubr.msk.f32.vlgmr.msra.gmra.mrb[2].mxu1 %vm533_vm3, %v441_v26 }
 0x138   : > { %1548 = vmatprep.mubr.msk.f32.mxu1 %vm1893_vm0, %v1894_v1 }
 0x1a2   : > { %v1716_v38 = vpop.permute.xlu1 %1715 }
 0x1a3   : > { %v1718_v42 = vunpack.i.h.bf16 %v1716_v38  ;;  %v1717_v43 = vunpack.i.l.bf16 %v1716_v38 }
 0x1a5   : > { %v1608_v45 = vpack.c.bf16 %v1718_v42, %v1717_v43  ;;  %v1236_v42 = vld [vmem:[#allocation5 + $0x8] sm:$0xff]  ;;  %v1237_v43 = vld [vmem:[#allocation5 + $0x10] sm:$0xff] }
 0x1a6   : > { %v704_v46 = vpop.permute.xlu1 %703 }
 0x20a   : > { %v609_v27 = vpop.f32.mrb[2].mxu1 }
 0x20b   : > { %v1529_v28 = vpop.f32.mrb[3].mxu1  ;;  %v613_v29 = vsel %vm451_vm1, %v609_v27, -inf }
 0x20c   : > { %614 = vmax.xlane.f32.xlu0 %v613_v29 }
 0x222   : > { %1710 = vrot.lane.b32.xlu0 %v2120_v21, %s1896_s10  ;;  %s1335_s10 = sshll.u32 %s342_s26, 4  ;;  %s2196_s10 = int_to_ptr.vmem [resolvable:$true] %s1335_s10 }
 0x223   : > { %s1816_s9 = scalar_lea.vmem %s2196_s10, 128 }
 0x224   : > { %p1817_p1 = scmp.ne.s32.totalorder %s2196_s10, %s1816_s9 }
 0x226   : > { %1720 = vrot.lane.b32.xlu0 %v2120_v21, %s1897_s12  ;;  %p1818_p3 = pnand %p1817_p1, %p2263_p2 }
 0x228   : > { %p1819_p4 = pneg %p1818_p3 }
 0x22a   : > { %1725 = vrot.lane.b32.xlu0 %v2120_v21, %s1898_s13 }
 0x22e   : > { %875 = vrot.lane.b32.xlu0 %v441_v26, %s1898_s13 }
 0x299   : > { %v615_v30 = vpop.xlane.xlu0 %614 }
 0x29a   : > { %v616_v31 = vsub.f32 %v609_v27, %v615_v30 }
 0x29c   : > { %v617_v32 = vmul.f32 1.442695, %v616_v31 }
 0x29d   : > { %v1711_v33 = vpop.permute.xlu0 %1710 }
 0x29e   : > { %1744 = vpow2.f32 %v617_v32  ;;  %v1713_v34 = vunpack.i.h.bf16 %v1711_v33  ;;  %v1712_v35 = vunpack.i.l.bf16 %v1711_v33 }
 0x2a0   : > { %v1605_v36 = vpack.c.bf16 %v1713_v34, %v1712_v35 }
 0x2a1   : > { %v1721_v37 = vpop.permute.xlu0 %1720 }
 0x2a2   : > { %v1723_v39 = vunpack.i.h.bf16 %v1721_v37  ;;  %v1722_v40 = vunpack.i.l.bf16 %v1721_v37  ;;  %1606 = vmatpush3.bf16.msra.mxu0 %v1605_v36 }
 0x2a3   : > { %1607 = vmatprep.subr.bf16.mxu0 %v1892_v0 }
 0x2a4   : > { %v1612_v41 = vpack.c.bf16 %v1723_v39, %v1722_v40 }
 0x2a5   : > { %v1726_v59 = vpop.permute.xlu0 %1725 }
 0x2a6   : > { %1613 = vmatpush3.bf16.msra.mxu1 %v1612_v41  ;;  %v1728_v61 = vunpack.i.h.bf16 %v1726_v59  ;;  %v1727_v62 = vunpack.i.l.bf16 %v1726_v59  ;;  %v1235_v41 = vld [vmem:[#allocation5] sm:$0xff] }
 0x2a7   : > { %1614 = vmatprep.subr.bf16.mxu1 %v1892_v0 }
 0x2a8   : > { %v2135_v44 = vpop.eup %1744  ;;  %v1615_v3 = vpack.c.bf16 %v1728_v61, %v1727_v62 }
 0x2a9   : > { %1535 = vmatmul.mubr.msk.f32.vlgmr.msra.gmra.mrb[2].mxu0 %vm451_vm1, %v2135_v44  ;;  %v876_v7 = vpop.permute.xlu0 %875  ;;  %v619_v34 = vsel %vm451_vm1, %v2135_v44, 0.0 }
 0x2aa   : > { %1541 = vmatprep.mubr.msk.f32.mxu0 %vm1893_vm0, %v1894_v1 }
 0x2ab   : > { %1610 = vmatpush3.bf16.xpose.msk.msra.mxu0 %vm2116_vm4, %v1608_v45  ;;  %v1238_v45 = vld [vmem:[#allocation5 + $0x18] sm:$0xff] }
 0x2ac   : > { %1618 = vmatprep.subr.bf16.mxu0 %v1892_v0  ;;  %v1632_v44 = vpack.c.bf16 %v1238_v45, %v1237_v43 }
 0x2b2   : > { %1542 = vmatmul.mubr.msk.f32.vlgmr.msra.gmra.mrb[4].mxu0 %vm533_vm3, %v704_v46 }
 0x2b3   : > { %1562 = vmatprep.mubr.msk.f32.mxu0 %vm1893_vm0, %v1894_v1 }
 0x37c   : > { %v2147_v47 = vpop.f32.mrb[2].mxu0 }
 0x37d   : > { %v1536_v48 = vpop.f32.mrb[3].mxu0 }
 0x385   : > { %v781_v49 = vpop.f32.mrb[4].mxu0 }
 0x386   : > { %v1543_v50 = vpop.f32.mrb[5].mxu0  ;;  %v785_v51 = vsel %vm451_vm1, %v781_v49, -inf }
 0x387   : > { %786 = vmax.xlane.f32.xlu1 %v785_v51 }
 0x398   : > { %1730 = vrot.lane.b32.xlu1 %v2120_v21, %s1899_s18  ;;  %s2194_s18 = scalar_lea.hbm %s2245_s8, %s1464_s25 }
 0x39c   : > { %1735 = vrot.lane.b32.xlu1 %v2120_v21, %s1900_s19 }
 0x3a0   : > { %1047 = vrot.lane.b32.xlu1 %v441_v26, %s1900_s19  ;;  %s1322_s19 = scalar_lea.sflag [#allocation4], %s340_s21 }
 0x3a4   : > { %1740 = vrot.lane.b32.xlu1 %v2120_v21, %s1901_s29  ;;  %s1905_s29 = smov [#allocation7]  }
 0x414   : > { %v787_v52 = vpop.xlane.xlu1 %786 }
 0x415   : > { %v788_v53 = vsub.f32 %v781_v49, %v787_v52 }
 0x417   : > { %v789_v54 = vmul.f32 1.442695, %v788_v53 }
 0x418   : > { %v1731_v55 = vpop.permute.xlu1 %1730 }
 0x419   : > { %1746 = vpow2.f32 %v789_v54  ;;  %v1733_v56 = vunpack.i.h.bf16 %v1731_v55  ;;  %v1732_v57 = vunpack.i.l.bf16 %v1731_v55 }
 0x41b   : > { %v1619_v58 = vpack.c.bf16 %v1733_v56, %v1732_v57 }
 0x41c   : > { %v1736_v60 = vpop.permute.xlu1 %1735 }
 0x41d   : > { %1620 = vmatpush3.bf16.msra.mxu0 %v1619_v58  ;;  %v1738_v18 = vunpack.i.h.bf16 %v1736_v60  ;;  %v1737_v19 = vunpack.i.l.bf16 %v1736_v60  ;;  %v1461_v60 = vld [vmem:[%s2244_s7] ss:$0 sm:$0xff] }
 0x41e   : > { %1621 = vmatprep.subr.bf16.mxu0 %v1892_v0 }
 0x41f   : > { %v1622_v22 = vpack.c.bf16 %v1738_v18, %v1737_v19 }
 0x420   : > { %v1048_v63 = vpop.permute.xlu1 %1047 }
 0x423   : > { %v1747_v2 = vpop.eup %1746 }
 0x424   : > { %1549 = vmatmul.mubr.msk.f32.vlgmr.msra.gmra.mrb[4].mxu1 %vm451_vm1, %v1747_v2  ;;  %v1741_v4 = vpop.permute.xlu1 %1740  ;;  %v791_v29 = vsel %vm451_vm1, %v1747_v2, 0.0 }
 0x425   : > { %1617 = vmatpush3.bf16.xpose.msk.msra.mxu1 %vm2116_vm4, %v1615_v3  ;;  %1555 = vmatprep.mubr.msk.f32.mxu1 %vm1893_vm0, %v1894_v1  ;;  %v1743_v5 = vunpack.i.h.bf16 %v1741_v4  ;;  %v1742_v6 = vunpack.i.l.bf16 %v1741_v4 }
 0x426   : > { %1625 = vmatprep.subr.bf16.mxu1 %v1892_v0 }
 0x427   : > { %v1626_v8 = vpack.c.bf16 %v1743_v5, %v1742_v6 }
 0x42c   : > { %1556 = vmatmul.mubr.msk.f32.vlgmr.msra.gmra.mrb[6].mxu1 %vm533_vm3, %v876_v7 }
 0x42d   : > { %1627 = vmatpush3.bf16.msra.mxu1 %v1626_v8  ;;  %1576 = vmatprep.mubr.msk.f32.mxu1 %vm1893_vm0, %v1894_v1 }
 0x42e   : > { %1628 = vmatprep.subr.bf16.mxu1 %v1892_v0 }
 0x4f7   : > { %v869_v9 = vpop.f32.mrb[4].mxu1 }
 0x4f8   : > { %v1550_v10 = vpop.f32.mrb[5].mxu1 }
 0x4ff   : > { %v953_v11 = vpop.f32.mrb[6].mxu1 }
 0x500   : > { %v1557_v12 = vpop.f32.mrb[7].mxu1  ;;  %v957_v14 = vsel %vm451_vm1, %v953_v11, -inf }
 0x501   : > { %958 = vmax.xlane.f32.xlu0 %v957_v14 }
 0x58e   : > { %v959_v15 = vpop.xlane.xlu0 %958 }
 0x58f   : > { %v960_v16 = vsub.f32 %v953_v11, %v959_v15 }
 0x591   : > { %v961_v17 = vmul.f32 1.442695, %v960_v16 }
 0x593   : > { %1748 = vpow2.f32 %v961_v17 }
 0x59d   : > { %v1749_v21 = vpop.eup %1748 }
 0x59e   : > { %1563 = vmatmul.mubr.msk.f32.vlgmr.msra.gmra.mrb[6].mxu0 %vm451_vm1, %v1749_v21  ;;  %v963_v23 = vsel %vm451_vm1, %v1749_v21, 0.0 }
 0x59f   : > { %1624 = vmatpush3.bf16.xpose.msk.msra.mxu0 %vm2116_vm4, %v1622_v22  ;;  %964 = vadd.xlane.f32.xlu1 %v963_v23 }
 0x5a0   : > { %1569 = vmatprep.mubr.msk.f32.mxu0 %vm1893_vm0, %v1894_v1 }
 0x5a6   : > { %1570 = vmatmul.mubr.msk.f32.vlgmr.msra.gmra.mrb[8].mxu0 %vm533_vm3, %v1048_v63 }
 0x62c   : > { %v965_v36 = vpop.xlane.xlu1 %964 }
 0x671   : > { %v1041_v24 = vpop.f32.mrb[6].mxu0 }
 0x672   : > { %v1564_v25 = vpop.f32.mrb[7].mxu0 }
 0x679   : > { %v1125_v26 = vpop.f32.mrb[8].mxu0 }
 0x67a   : > { %v1571_v27 = vpop.f32.mrb[9].mxu0  ;;  %v1129_v28 = vsel %vm451_vm1, %v1125_v26, -inf }
 0x67b   : > { %1130 = vmax.xlane.f32.xlu0 %v1129_v28 }
 0x67f   : > { %792 = vadd.xlane.f32.xlu0 %v791_v29 }
 0x708   : > { %v1131_v30 = vpop.xlane.xlu0 %1130 }
 0x709   : > { %v1132_v31 = vsub.f32 %v1125_v26, %v1131_v30 }
 0x70b   : > { %v1133_v20 = vmul.f32 1.442695, %v1132_v31 }
 0x70c   : > { %v793_v35 = vpop.xlane.xlu0 %792 }
 0x70d   : > { %1750 = vpow2.f32 %v1133_v20 }
 0x70e   : > { %1752 = vrcp.f32 %v793_v35 }
 0x70f   : > { %1754 = vrcp.f32 %v965_v36 }
 0x717   : > { %v1751_v32 = vpop.eup %1750 }
 0x718   : > { %1577 = vmatmul.mubr.msk.f32.vlgmr.msra.gmra.mrb[8].mxu1 %vm451_vm1, %v1751_v32  ;;  %v1135_v33 = vsel %vm451_vm1, %v1751_v32, 0.0  ;;  %v1753_v37 = vpop.eup %1752 }
 0x719   : > { %1136 = vadd.xlane.f32.xlu0 %v1135_v33  ;;  %1587 = vmatprep.mubr.msk.f32.mxu1 %vm1893_vm0, %v1894_v1  ;;  %v874_v38 = vmul.f32 %v1753_v37, %v869_v9  ;;  %v1755_v39 = vpop.eup %1754  ;;  %v1629_v1 = vpack.c.bf16 %v1236_v42, %v1235_v41 }
 0x71a   : > { %v1046_v40 = vmul.f32 %v1755_v39, %v1041_v24 }
 0x71b   : > { %1630 = vmatpush3.bf16.msra.mxu1 %v1629_v1 }
 0x71c   : > { %1631 = vmatprep.subr.bf16.mxu1 %v1892_v0 }
 0x71d   : > { %620 = vadd.xlane.f32.xlu0 %v619_v34 }
 0x71f   : > { %1633 = vmatpush3.bf16.msra.mxu1 %v1632_v44 }
 0x733   : > { %1220 = vrot.lane.b32.xlu0 %v874_v38, %s1902_s14  ;;  %s1820_s14 = sshll.u32 %s1905_s29, 4  ;;  %s1821_s14 = int_to_ptr.vmem [resolvable:$false] %s1820_s14 }
 0x734   : > { %p1823_p7 = scmp.lt.s32.totalorder %s2196_s10, %s1821_s14 }
 0x737   : > { %1224 = vrot.lane.b32.xlu0 %v1046_v40, %s1903_s20  ;;  %s1822_s20 = scalar_lea.vmem %s1821_s14, 256 }
 0x738   : > { %p1824_p8 = scmp.lt.s32.totalorder %s1822_s20, %s1816_s9 }
 0x73a   : > { %p1825_p11 = por %p1824_p8, %p1823_p7 }
 0x73c   : > { %p1826_p13 = pnand %p1825_p11, %p1819_p4 }
 0x7a6   : > { %v1137_v46 = vpop.xlane.xlu0 %1136 }
 0x7a7   : > { %1756 = vrcp.f32 %v1137_v46 }
 0x7aa   : > { %v621_v52 = vpop.xlane.xlu0 %620 }
 0x7ab   : > { %1758 = vrcp.f32 %v621_v52 }
 0x7ae   : > { %v1221_v55 = vpop.permute.xlu0 %1220 }
 0x7b1   : > { %v1757_v48 = vpop.eup %1756 }
 0x7b2   : > { %v1225_v0 = vpop.permute.xlu0 %1224 }
 0x7b5   : > { %v1759_v53 = vpop.eup %1758 }
 0x7b6   : > { %v702_v54 = vmul.f32 %v1759_v53, %v2147_v47 }
 0x7b8   : > { %v1231_v56 = vsel %vm533_vm3, %v702_v54, %v1221_v55 }
 0x7b9   : > { %v1232_v57 = vsel %vm451_vm1, %v1231_v56, %v1225_v0 }
 0x7eb   : > { %v1213_v49 = vpop.f32.mrb[8].mxu1 }
 0x7ec   : > { %v1218_v50 = vmul.f32 %v1757_v48, %v1213_v49  ;;  %v1578_v51 = vpop.f32.mrb[9].mxu1 }
 0x7ee   : > { %1228 = vrot.lane.b32.xlu1 %v1218_v50, %s1904_s22 }
 0x860   : > { %v1229_v58 = vpop.permute.xlu1 %1228 }
 0x861   : > { %v1234_v59 = vsel %vm1233_vm5, %v1232_v57, %v1229_v58 }
 0x862   : > { %1588 = vmatmul.mubr.msk.f32.vlgmr.msra.gmra.mrb[10].mxu1 %vm367_vm2, %v1234_v59 }
 0x935   : > { %v1315_v61 = vpop.f32.mrb[10].mxu1 }
 0x936   : > { %v1316_v47 = vadd.f32 %v1461_v60, %v1315_v61  ;;  %v1589_v62 = vpop.f32.mrb[11].mxu1 }
 0x938   : > { %v1319_v63 = vadd.f32 %v1316_v47, %v2099_v13 }
 0x93a   : > { %1320 = vst.msk [vmem:[%s342_s26] sm:$0xff] %vm367_vm2, %v1319_v63 }
 0x93b   : > { %1829 = shalt.err (!%p1826_p13)
}
 0x93c   : > { %s1830_s22 = scalar_lea.hbm %s2194_s18, 128  ;;  %s1834_s23 = scalar_lea.hbm %s2245_s8, 256 }
 0x93d   : > { %p1831_p5 = scmp.ne.s32.totalorder %s2194_s18, %s1830_s22  ;;  %p1835_p9 = scmp.lt.u32.totalorder %s2194_s18, %s2245_s8 }
 0x93e   : > { %p1836_p12 = scmp.lt.u32.totalorder %s1834_s23, %s1830_s22  ;;  %p1838_p1 = scmp.lt.u32.totalorder %s1830_s22, %s2194_s18 }
 0x93f   : > { %p1832_p0 = pnand %p1831_p5, %p2263_p2 }
 0x940   : > { %p1837_p10 = por %p1836_p12, %p1835_p9 }
 0x941   : > { %p1833_p6 = pneg %p1832_p0 }
 0x942   : > { %p1839_p3 = por %p1838_p1, %p1837_p10 }
 0x944   : > { %p1840_p4 = pnand %p1839_p3, %p1833_p6 }
 0x946   : > { %1843 = shalt.err (!%p1840_p4)
}
 0x947   : > { %1642 = dma.vmem_to_hbm [thread:$0]  (%p2263_p2), %s2196_s10, 128, %s2194_s18, %s1322_s19  }
 0x948 PF: > { %p1659_p7 = scmp.ge.s32.totalorder %s1886_s30, 2  ;;  %s1347_s26 = sand.u32 1, %s1874_s27  }
 0x949   : > { %p2264_p8 = scmp.ne.s32.totalorder %s2253_s16, 0  ;;  %s1348_s12 = scalar_lea.sflag [#allocation4], %s1347_s26 }
 0x94b   : > { %p1652_p11 = pnand %p1659_p7, %p2264_p8 }
 0x94d   : > { %1869 = dma.done.wait (!%p1652_p11), %s1348_s12, 128  }
 0x94e   : > { %1871 = vsyncadd (!%p1652_p11), %s1348_s12, 4294967168  ;;  %s2265_s13 = sld [smem:[#allocation11_spill]]  ;;  %s2266_s29 = sld [smem:[#allocation12_spill]] }
 0x94f   : > { %p20_p13 = scmp.ge.s32.totalorder %s1976_s11, 4   ;;  %s2267_s27 = smov %s1878_s28 }
 0x950   : > { %s2269_s30 = smov %s1976_s11 }
 0x951   :  { %22 = sbr.rel (!%p20_p13) target bundleno = 5 (0x5), region = 99 }
 0x954   : > { %s2268_s28 = smov %s2265_s13 }
 0x958   :  { %1353 = vsyncpa [#allocation3], 1 }
 0x959   :  { %1355 = vsyncpa [#allocation3 + $0x1], 1 }
 0x95a   :  { %1356 = vsyncpa [#allocation6], 1 }
 0x95b   :  { %1357 = vsyncpa [#allocation4], 1 }
 0x95c   :  { %1359 = vsyncpa [#allocation4 + $0x1], 1 }

</bundles_post_ra>
